<compile_context>
chip_gen: v7x
topology: tpu7x:2x2x1
jax: 0.10.0
libtpu: 0.0.40
codegen_flags: <defaults>
</compile_context>

<pallas_src>
import jax
import jax.numpy as jnp
from jax.experimental import pallas as pl
from jax.experimental.pallas import tpu as pltpu

_LANE = 128


def _adv_loss_kernel(x_ref, o_ref):
    """x_ref: (B, rows_tile, 128) VMEM tile; o_ref: (rows_tile, 128)."""
    x = x_ref[...].astype(jnp.float32)            # log / reduce in f32
    o_ref[...] = (-1.0 * jnp.sum(jnp.log(x), axis=0)).astype(o_ref.dtype)


def _make_batch_tiled_kernel(batch, b_tile, nb):
    """Accumulating variant for very large B: grid = (row_blocks, b_blocks)."""
    rem = batch - (nb - 1) * b_tile               # valid rows in last B block (static)

    def kernel(x_ref, o_ref, acc_ref):
        b = pl.program_id(1)

        @pl.when(b == 0)
        def _():
            acc_ref[...] = jnp.zeros_like(acc_ref)

        logs = jnp.log(x_ref[...].astype(jnp.float32))
        if rem == b_tile:                         # B % b_tile == 0: no ragged block
            acc_ref[...] += jnp.sum(logs, axis=0)
        else:                                     # static remainder: pick partial sum on last b
            full = jnp.sum(logs, axis=0)
            part = jnp.sum(logs[:rem], axis=0)
            acc_ref[...] += jnp.where(b == nb - 1, part, full)

        @pl.when(b == nb - 1)
        def _():
            o_ref[...] = (-1.0 * acc_ref[...]).astype(o_ref.dtype)

    return kernel


def adversarial_loss(x, *, buffer_budget_bytes=8 << 20, megacore_split_rows=512):
    """-sum(log(x), axis=0). x: (B, *feat), strictly positive. Returns feat-shaped array."""
    B = int(x.shape[0])
    feat_shape = x.shape[1:]
    N = 1
    for d in feat_shape:
        N *= int(d)

    itemsize = jnp.dtype(x.dtype).itemsize
    sub = max(8, 32 // itemsize)                  # min sublane tile: f32->8, bf16->16, 8-bit->32

    R = pl.cdiv(N, _LANE)                         # 128-lane rows in the flattened feature dim
    N_row = R * _LANE
    R_aligned = pl.cdiv(R, sub) * sub

    x2 = x.reshape(B, N)
    if N_row != N:
        # Only the last partial 128-lane row is padded (log(1) == 0, and those
        # lanes live past N so they are sliced off below).
        x2 = jnp.pad(x2, ((0, 0), (0, N_row - N)), constant_values=1.0)
    x3 = x2.reshape(B, R, _LANE)

    row_bytes_full_b = B * _LANE * itemsize
    if sub * row_bytes_full_b <= buffer_budget_bytes:
        # Common path: all of B in one block; sum over B is a plain VPU add.
        rows_tile = max(sub, (buffer_budget_bytes // row_bytes_full_b) // sub * sub)
        rows_tile = min(rows_tile, R_aligned)
        if rows_tile >= R:
            if R_aligned >= megacore_split_rows:
                # Single-block but non-tiny: split in two so both v7x TCs get work.
                rows_tile = pl.cdiv(pl.cdiv(R_aligned, 2), sub) * sub
            else:
                rows_tile = R                     # exact full-dim block, no ragged block
        grid = (pl.cdiv(R, rows_tile),)
        kernel = _adv_loss_kernel
        in_specs = [pl.BlockSpec((B, rows_tile, _LANE), lambda j: (0, j, 0))]
        out_specs = pl.BlockSpec((rows_tile, _LANE), lambda j: (j, 0))
        scratch_shapes = []
        dim_sem = ("parallel",)
    else:
        # Huge batch: minimal row block, tile B on a trailing reduction axis,
        # accumulate in f32 VMEM scratch.
        rows_tile = min(sub, R)
        b_tile = min(B, max(1, buffer_budget_bytes // (rows_tile * _LANE * itemsize)))
        nb = pl.cdiv(B, b_tile)
        grid = (pl.cdiv(R, rows_tile), nb)
        kernel = _make_batch_tiled_kernel(B, b_tile, nb)
        in_specs = [pl.BlockSpec((b_tile, rows_tile, _LANE), lambda j, b: (b, j, 0))]
        out_specs = pl.BlockSpec((rows_tile, _LANE), lambda j, b: (j, 0))
        scratch_shapes = [pltpu.VMEM((rows_tile, _LANE), jnp.float32)]
        dim_sem = ("parallel", "arbitrary")

    out = pl.pallas_call(
        kernel,
        out_shape=jax.ShapeDtypeStruct((R, _LANE), x.dtype),
        grid=grid,
        in_specs=in_specs,
        out_specs=out_specs,
        scratch_shapes=scratch_shapes,
        compiler_params=pltpu.CompilerParams(
            dimension_semantics=dim_sem,
            # Worst case ~24 MiB (2x8 MiB input + 2x4 MiB output); above v5e's
            # 16 MiB scoped default, comfortably under v7x's 64 MiB VMEM.
            vmem_limit_bytes=40 << 20,
        ),
    )(x3)

    if N_row != N:
        return out.reshape(N_row)[:N].reshape(feat_shape)
    return out.reshape(feat_shape)


if __name__ == "__main__":
    key = jax.random.PRNGKey(0)

    # Main check: discriminator outputs (e.g. post-sigmoid), strictly positive.
    B, C, H, W = 2, 4, 16, 16
    x = jax.random.uniform(key, (B, C, H, W), dtype=jnp.float32,
                           minval=1e-3, maxval=1.0)
    out = jax.block_until_ready(adversarial_loss(x))
    ref = -1.0 * jnp.sum(jnp.log(x), axis=0)
    assert out.shape == (C, H, W)
    assert jnp.allclose(out, ref, rtol=1e-5, atol=1e-5)

    # Ragged feature dim (N % 128 != 0): exercises the small lane-pad path.
    x2 = jax.random.uniform(jax.random.PRNGKey(1), (2, 3, 5, 7), dtype=jnp.float32,
                            minval=1e-3, maxval=1.0)
    out2 = jax.block_until_ready(adversarial_loss(x2))
    ref2 = -1.0 * jnp.sum(jnp.log(x2), axis=0)
    assert out2.shape == (3, 5, 7)
    assert jnp.allclose(out2, ref2, rtol=1e-5, atol=1e-5)

    # Multi-step grid with a ragged last row block (tiny budget forces >1 step).
    x3 = jax.random.uniform(jax.random.PRNGKey(2), (2, 4, 20, 16), dtype=jnp.float32,
                            minval=1e-3, maxval=1.0)
    out3 = jax.block_until_ready(adversarial_loss(x3, buffer_budget_bytes=8 * 1024))
    ref3 = -1.0 * jnp.sum(jnp.log(x3), axis=0)
    assert jnp.allclose(out3, ref3, rtol=1e-5, atol=1e-5)

    # Batch-tiled accumulator fallback (budget too small for all of B at once,
    # with a ragged last B block).
    x4 = jax.random.uniform(jax.random.PRNGKey(3), (3, 4, 16, 16), dtype=jnp.float32,
                            minval=1e-3, maxval=1.0)
    out4 = jax.block_until_ready(adversarial_loss(x4, buffer_budget_bytes=8 * 1024))
    ref4 = -1.0 * jnp.sum(jnp.log(x4), axis=0)
    assert jnp.allclose(out4, ref4, rtol=1e-5, atol=1e-5)

    print("KERNEL_OK")
</pallas_src>

<mosaic_0001>
module attributes {stable_mosaic.version = 11 : i64} {
  func.func @_adv_loss_kernel(%arg0: i32, %arg1: memref<2x8x128xf32, #tpu.memory_space<vmem>>, %arg2: memref<8x128xf32, #tpu.memory_space<vmem>>) attributes {dimension_semantics = [#tpu.dimension_semantics<parallel>], iteration_bounds = array<i64: 1>, scalar_prefetch = 0 : i64, scratch_operands = 0 : i64, tpu.core_type = #tpu.core_type<tc>, window_params = [{transform_indices = @transform_0, window_bounds = array<i64: 2, 8, 128>}, {transform_indices = @transform_1, window_bounds = array<i64: 8, 128>}]} {
    %c0 = arith.constant 0 : index
    %c0_0 = arith.constant 0 : index
    %c0_1 = arith.constant 0 : index
    %0 = vector.load %arg1[%c0, %c0_0, %c0_1] : memref<2x8x128xf32, #tpu.memory_space<vmem>>, vector<2x8x128xf32>
    %1 = math.log %0 : vector<2x8x128xf32>
    %cst = arith.constant dense<0.000000e+00> : vector<8x128xf32>
    %2 = vector.multi_reduction <add>, %1, %cst [0] : vector<2x8x128xf32> to vector<8x128xf32>
    %cst_2 = arith.constant -1.000000e+00 : f32
    %3 = vector.broadcast %cst_2 : f32 to vector<8x128xf32>
    %4 = arith.mulf %3, %2 : vector<8x128xf32>
    %c0_3 = arith.constant 0 : index
    %c0_4 = arith.constant 0 : index
    %5 = vector.load %arg2[%c0_3, %c0_4] : memref<8x128xf32, #tpu.memory_space<vmem>>, vector<8x128xf32>
    tpu.vector_store %arg2[%c0_3, %c0_4], %4 {strides = array<i32>} : memref<8x128xf32, #tpu.memory_space<vmem>>, vector<8x128xf32>,
    return
  }
  func.func @transform_0(%arg0: i32) -> (i32, i32, i32) {
    %c0_i32 = arith.constant 0 : i32
    %c0_i32_0 = arith.constant 0 : i32
    %c0_i32_1 = arith.constant 0 : i32
    return %c0_i32, %arg0, %c0_i32_0 : i32, i32, i32
  }
  func.func @transform_1(%arg0: i32) -> (i32, i32) {
    %c0_i32 = arith.constant 0 : i32
    %c0_i32_0 = arith.constant 0 : i32
    return %arg0, %c0_i32 : i32, i32
  }
}

</mosaic_0001>

<bundles_post_ra>
// kernel: tpu_custom_call.1
= control target key start
LH: loop header
LB: loop body
LE: loop exit
PB: predicated region body
PF: predicated region fallthrough
CT: control target
= control target key end

     0   :  { %6 = vsyncpa [#allocation3], 0  ;;  %s141_s0 = inlined_call_operand.hbm [shape: f32[2,8,128], index: 0, kind: input, shape index: {}]   ;;  %s142_s1 = inlined_call_operand.hbm [shape: f32[8,128], index: 1, kind: output, shape index: {}]  }
   0x1   :  { %7 = vsyncpa [#allocation4], 0  ;;  %s103_s6 = smov [#allocation2]   ;;  %s55_s10 = scalar_lea.hbm %s141_s0, 256 }
   0x2   :  { %s13_s7 = sshll.u32 %s103_s6, 4  ;;  %p56_p0 = scmp.ne.s32.totalorder %s141_s0, %s55_s10  ;;  %s14_s7 = int_to_ptr.vmem [resolvable:$true] %s13_s7 }
   0x3   :  { %p59_p1 = scmp.lt.u32.totalorder %s55_s10, %s141_s0 }
   0x5   :  { %p61_p2 = pnand %p59_p1, %p56_p0 }
   0x7   :  { %64 = shalt.err (!%p61_p2)
}
   0x8   :  { %s65_s15 = scalar_lea.vmem %s14_s7, 256  ;;  %p70_p4 = scmp.lt.s32.totalorder %s14_s7, %s14_s7 }
   0x9   :  { %p66_p3 = scmp.ne.s32.totalorder %s14_s7, %s65_s15  ;;  %p71_p5 = scmp.lt.s32.totalorder %s65_s15, %s65_s15 }
   0xb   :  { %p72_p6 = por %p71_p5, %p70_p4 }
   0xd   :  { %p73_p7 = pnand %p72_p6, %p66_p3 }
   0xf   :  { %76 = shalt.err (!%p73_p7)
}
  0x10   :  { %s104_s16 = smov 128   ;;  %s105_s17 = smov 8  }
  0x11   :  { %19 = dma.hbm_to_vmem [thread:$0]  %s141_s0, 256, %s14_s7, [#allocation3], %s104_s16, %s104_s16, %s105_s17  }
  0x12   :  { %99 = dma.done.wait [#allocation3], 256  }
  0x13   :  { %100 = vsyncadd [#allocation3], 4294967040  ;;  %v23_v0 = vld [vmem:[#allocation2] sm:$0xff]  ;;  %v24_v1 = vld [vmem:[#allocation2 + $0x8] sm:$0xff]  ;;  %s106_s20 = smov [#allocation5]  }
  0x14   :  { %51 = vlog2.f32 %v23_v0  ;;  %s38_s21 = sshll.u32 %s106_s20, 4  ;;  %s39_s21 = int_to_ptr.vmem [resolvable:$true] %s38_s21 }
  0x15   :  { %53 = vlog2.f32 %v24_v1  ;;  %s77_s22 = scalar_lea.vmem %s39_s21, 128  ;;  %p82_p9 = scmp.lt.s32.totalorder %s39_s21, %s39_s21 }
  0x16   :  { %p78_p8 = scmp.ne.s32.totalorder %s39_s21, %s77_s22  ;;  %p83_p10 = scmp.lt.s32.totalorder %s77_s22, %s77_s22 }
  0x18   :  { %p84_p11 = por %p83_p10, %p82_p9 }
  0x1a   :  { %p85_p12 = pnand %p84_p11, %p78_p8 }
  0x1e   :  { %v52_v2 = vpop.eup %51 }
  0x1f   :  { %v54_v3 = vpop.eup %53  ;;  %v26_v4 = vmul.f32 0.6931472, %v52_v2 }
  0x20   :  { %v28_v5 = vmul.f32 0.6931472, %v54_v3 }
  0x22   :  { %v29_v6 = vadd.f32 %v28_v5, %v26_v4 }
  0x24   :  { %v30_v7 = vmul.f32 -1.0, %v29_v6 }
  0x26   :  { %31 = vst [vmem:[#allocation5] sm:$0xff] %v30_v7 }
  0x27   :  { %88 = shalt.err (!%p85_p12)
}
  0x28   :  { %s89_s24 = scalar_lea.hbm %s142_s1, 128 }
  0x29   :  { %p90_p13 = scmp.ne.s32.totalorder %s142_s1, %s89_s24  ;;  %p93_p0 = scmp.lt.u32.totalorder %s89_s24, %s142_s1 }
  0x2b   :  { %p95_p1 = pnand %p93_p0, %p90_p13 }
  0x2d   :  { %98 = shalt.err (!%p95_p1)
}
  0x2e   :  { %41 = dma.vmem_to_hbm [thread:$0]  %s39_s21, 128, %s142_s1, [#allocation4]  }
  0x2f   :  { %101 = dma.done.wait [#allocation4], 128  }
  0x30   :  { %102 = vsyncadd [#allocation4], 4294967168 }
  0x31   :  { %45 = vsyncpa [#allocation3], 1 }
  0x32   :  { %46 = vsyncpa [#allocation4], 1 }

</bundles_post_ra>
